<compile_context>
chip_gen: v6e
topology: v6e:2x2x1
jax: 0.10.0
libtpu: 0.0.40
codegen_flags: <defaults>
</compile_context>

<pallas_src>
import functools

import jax
import jax.numpy as jnp
from jax import lax
from jax.experimental import pallas as pl
from jax.experimental.pallas import tpu as pltpu

IMG_FEAT = 1000   # resnet18 output features
EMB = 300         # nn.Embedding(V, 300) / nn.Linear(1000, 300)
HID = 512         # nn.RNN(300, 512)


def _round_up(x, m):
    return (x + m - 1) // m * m


# ----------------------------------------------------------------------------
# Generic tiled matmul + bias:  out = x @ w + b   (bf16 inputs, f32 accumulate)
# ----------------------------------------------------------------------------
def _matmul_bias_kernel(x_ref, w_ref, b_ref, o_ref, acc_ref):
    k = pl.program_id(2)

    @pl.when(k == 0)
    def _():
        acc_ref[...] = jnp.zeros_like(acc_ref)

    acc_ref[...] += jnp.dot(x_ref[...], w_ref[...],
                            preferred_element_type=jnp.float32)

    @pl.when(k == pl.num_programs(2) - 1)
    def _():
        o_ref[...] = (acc_ref[...] + b_ref[...].astype(jnp.float32)
                      ).astype(o_ref.dtype)


def pallas_matmul_bias(x, w, b, *, out_dtype=jnp.float32,
                       tm=256, tn=512, tk=512):
    """out = x @ w + b with (8,128)-aligned padding and a parallel tiled grid."""
    M, K = x.shape
    Kw, N = w.shape
    assert K == Kw, (K, Kw)

    tm = min(tm, _round_up(M, 8))
    tn = min(tn, _round_up(N, 128))
    tk = min(tk, _round_up(K, 128))
    Mp, Kp, Np = _round_up(M, tm), _round_up(K, tk), _round_up(N, tn)

    xp = jnp.pad(x, ((0, Mp - M), (0, Kp - K)))
    wp = jnp.pad(w, ((0, Kp - K), (0, Np - N)))
    bp = jnp.pad(b.reshape(1, -1).astype(jnp.float32), ((0, 0), (0, Np - N)))

    out = pl.pallas_call(
        _matmul_bias_kernel,
        out_shape=jax.ShapeDtypeStruct((Mp, Np), out_dtype),
        grid_spec=pltpu.PrefetchScalarGridSpec(
            num_scalar_prefetch=0,
            grid=(Mp // tm, Np // tn, Kp // tk),
            in_specs=[
                pl.BlockSpec((tm, tk), lambda i, j, k: (i, k)),   # x tile
                pl.BlockSpec((tk, tn), lambda i, j, k: (k, j)),   # w tile
                pl.BlockSpec((1, tn), lambda i, j, k: (0, j)),    # bias tile
            ],
            out_specs=pl.BlockSpec((tm, tn), lambda i, j, k: (i, j)),
            scratch_shapes=[pltpu.VMEM((tm, tn), jnp.float32)],
        ),
        compiler_params=pltpu.CompilerParams(
            dimension_semantics=("parallel", "parallel", "arbitrary"),
        ),
    )(xp, wp, bp)
    return out[:M, :N]


# ----------------------------------------------------------------------------
# Sequential recurrence:  h_t = tanh(pre_x[t] + h_{t-1} @ W_hh)
# One grid step processes a chunk of Tc timesteps.
# ----------------------------------------------------------------------------
def _rnn_chunk_kernel(prex_ref, h0_ref, whh_ref, out_ref, h_scratch):
    c = pl.program_id(0)

    @pl.when(c == 0)
    def _():
        h_scratch[...] = h0_ref[...]

    tc = prex_ref.shape[0]
    whh = whh_ref[...]                                   # (HID, HID) bf16, resident

    def body(i, h):
        pre = prex_ref[i] + jnp.dot(h.astype(whh.dtype), whh,
                                    preferred_element_type=jnp.float32)
        h_new = jnp.tanh(pre)
        out_ref[i] = h_new.astype(out_ref.dtype)
        return h_new

    h_final = lax.fori_loop(0, tc, body, h_scratch[...], unroll=True)
    h_scratch[...] = h_final


def rnn_recurrence(pre_x, h0, w_hh, *, tc=8):
    """pre_x: (T, Bp, HID) f32 (bias already folded in); h0: (Bp, HID) f32."""
    T, Bp, H = pre_x.shape
    tc = min(tc, T)
    Tp = _round_up(T, tc)
    if Tp != T:
        pre_x = jnp.pad(pre_x, ((0, Tp - T), (0, 0), (0, 0)))

    out = pl.pallas_call(
        _rnn_chunk_kernel,
        out_shape=jax.ShapeDtypeStruct((Tp, Bp, H), jnp.float32),
        grid_spec=pltpu.PrefetchScalarGridSpec(
            num_scalar_prefetch=0,
            grid=(Tp // tc,),
            in_specs=[
                pl.BlockSpec((tc, Bp, H), lambda c: (c, 0, 0)),   # pre_x chunk
                pl.BlockSpec((Bp, H), lambda c: (0, 0)),          # h0
                pl.BlockSpec((H, H), lambda c: (0, 0)),           # W_hh (resident)
            ],
            out_specs=pl.BlockSpec((tc, Bp, H), lambda c: (c, 0, 0)),
            scratch_shapes=[pltpu.VMEM((Bp, H), jnp.float32)],    # carried hidden
        ),
        compiler_params=pltpu.CompilerParams(
            dimension_semantics=("arbitrary",),                   # true recurrence
        ),
    )(pre_x, h0, w_hh)
    return out[:T]


# ----------------------------------------------------------------------------
# Full forward pass
# ----------------------------------------------------------------------------
def image_captioning_forward(image_feats, padded_seqs, initial_hidden, params,
                             *, tc=8):
    """
    image_feats    : (B, 1000) f32   resnet18 features (backbone not in Pallas)
    padded_seqs    : (T, B) int32    token ids, seq-major (batch_first=False)
    initial_hidden : (1, B, HID) f32
    returns (predictions (T, B, V) f32, finalHiddenState (1, B, HID) f32)
    """
    T, B = padded_seqs.shape
    V = params["embedding"].shape[0]
    Bp = _round_up(B, 8)                       # pad batch to sublane multiple

    # bf16 weights/embeddings for the MXU; biases stay f32 (added post-accum).
    emb_table = params["embedding"].astype(jnp.bfloat16)       # (V, EMB)
    w_img = params["w_img"].astype(jnp.bfloat16)                # (1000, EMB)
    w_ih = params["w_ih"].astype(jnp.bfloat16)                  # (EMB, HID)
    w_hh = params["w_hh"].astype(jnp.bfloat16)                  # (HID, HID)
    w_c = params["w_c"].astype(jnp.bfloat16)                    # (HID, V)
    b_img = params["b_img"].astype(jnp.float32)
    rnn_bias = (params["b_ih"] + params["b_hh"]).astype(jnp.float32)
    b_c = params["b_c"].astype(jnp.float32)

    seqs_p = jnp.pad(padded_seqs, ((0, 0), (0, Bp - B)))
    feats_p = jnp.pad(image_feats, ((0, Bp - B), (0, 0))).astype(jnp.bfloat16)
    h0_p = jnp.pad(initial_hidden[0].astype(jnp.float32),
                   ((0, Bp - B), (0, 0)))                       # (Bp, HID)

    # image_embedder: one batched Pallas matmul (hoisted, parallel grid).
    img_emb = pallas_matmul_bias(feats_p, w_img, b_img)          # (Bp, EMB) f32

    # embedder: pure gather, left to XLA.
    seq_emb = emb_table[seqs_p]                                  # (T, Bp, EMB) bf16

    # embeddingVectors: image embedding at t=0, word embeddings at t=1..T-1.
    emb_vec = jnp.concatenate(
        [img_emb[None].astype(jnp.bfloat16), seq_emb[:T - 1]], axis=0)

    # Hoisted input projection with the RNN bias fused in:
    #   pre_x = emb_vec @ W_ih + (b_ih + b_hh)
    pre_x = pallas_matmul_bias(emb_vec.reshape(T * Bp, EMB), w_ih, rnn_bias)
    pre_x = pre_x.reshape(T, Bp, HID)

    # Sequential recurrence (only h @ W_hh + tanh stays in the T loop).
    rnn_out = rnn_recurrence(pre_x, h0_p, w_hh, tc=tc)           # (T, Bp, HID) f32
    final_hidden = rnn_out[T - 1, :B][None]                      # (1, B, HID)

    # Hoisted classifier: one big batched matmul over all T*Bp rows,
    # tiled over V (classifier weight never fully resident in VMEM).
    logits = pallas_matmul_bias(
        rnn_out.reshape(T * Bp, HID).astype(jnp.bfloat16), w_c, b_c)
    predictions = logits.reshape(T, Bp, V)[:, :B, :]             # (T, B, V)
    return predictions, final_hidden


# ----------------------------------------------------------------------------
# Pure-JAX f32 reference for correctness checking
# ----------------------------------------------------------------------------
def reference_forward(image_feats, padded_seqs, initial_hidden, params):
    T = padded_seqs.shape[0]
    img_emb = image_feats @ params["w_img"] + params["b_img"]     # (B, EMB)
    seq_emb = params["embedding"][padded_seqs]                    # (T, B, EMB)
    emb = jnp.concatenate([img_emb[None], seq_emb[:T - 1]], axis=0)
    bias = params["b_ih"] + params["b_hh"]

    def step(h, x_t):
        h_new = jnp.tanh(x_t @ params["w_ih"] + h @ params["w_hh"] + bias)
        return h_new, h_new

    h_last, outs = lax.scan(step, initial_hidden[0], emb)
    logits = outs @ params["w_c"] + params["b_c"]
    return logits, h_last[None]


if __name__ == "__main__":
    T, B, V = 8, 2, 512   # small synthetic vocabularySize

    key = jax.random.PRNGKey(0)
    ks = jax.random.split(key, 11)
    s_img = 1.0 / jnp.sqrt(jnp.float32(IMG_FEAT))
    s_rnn = 1.0 / jnp.sqrt(jnp.float32(HID))
    s_cls = 1.0 / jnp.sqrt(jnp.float32(HID))

    params = {
        "embedding": jax.random.normal(ks[0], (V, EMB), jnp.float32) * 0.1,
        "w_img": jax.random.uniform(ks[1], (IMG_FEAT, EMB), jnp.float32,
                                    -s_img, s_img),
        "b_img": jax.random.uniform(ks[2], (EMB,), jnp.float32, -s_img, s_img),
        "w_ih": jax.random.uniform(ks[3], (EMB, HID), jnp.float32, -s_rnn, s_rnn),
        "w_hh": jax.random.uniform(ks[4], (HID, HID), jnp.float32, -s_rnn, s_rnn),
        "b_ih": jax.random.uniform(ks[5], (HID,), jnp.float32, -s_rnn, s_rnn),
        "b_hh": jax.random.uniform(ks[6], (HID,), jnp.float32, -s_rnn, s_rnn),
        "w_c": jax.random.uniform(ks[7], (HID, V), jnp.float32, -s_cls, s_cls),
        "b_c": jax.random.uniform(ks[8], (V,), jnp.float32, -s_cls, s_cls),
    }

    padded_seqs = jax.random.randint(ks[9], (T, B), 0, V, dtype=jnp.int32)
    image_feats = jax.random.normal(ks[10], (B, IMG_FEAT), jnp.float32)
    initial_hidden = jnp.zeros((1, B, HID), jnp.float32)

    preds, hfin = image_captioning_forward(image_feats, padded_seqs,
                                           initial_hidden, params)
    jax.block_until_ready((preds, hfin))

    assert preds.shape == (T, B, V), preds.shape
    assert hfin.shape == (1, B, HID), hfin.shape

    ref_preds, ref_hfin = reference_forward(image_feats, padded_seqs,
                                            initial_hidden, params)
    # bf16 weights + f32 accumulation vs all-f32 reference.
    assert jnp.allclose(preds, ref_preds, rtol=2e-2, atol=2e-2), (
        float(jnp.max(jnp.abs(preds - ref_preds))))
    assert jnp.allclose(hfin, ref_hfin, rtol=2e-2, atol=2e-2), (
        float(jnp.max(jnp.abs(hfin - ref_hfin))))

    print("KERNEL_OK")
</pallas_src>

<mosaic_0001>
module attributes {stable_mosaic.version = 11 : i64} {
  func.func @_matmul_bias_kernel(%arg0: i32, %arg1: i32, %arg2: i32, %arg3: memref<8x512xbf16, #tpu.memory_space<vmem>>, %arg4: memref<512x384xbf16, #tpu.memory_space<vmem>>, %arg5: memref<1x384xf32, #tpu.memory_space<vmem>>, %arg6: memref<8x384xf32, #tpu.memory_space<vmem>>, %arg7: memref<8x384xf32, #tpu.memory_space<vmem>>) attributes {dimension_semantics = [#tpu.dimension_semantics<parallel>, #tpu.dimension_semantics<parallel>, #tpu.dimension_semantics<arbitrary>], iteration_bounds = array<i64: 1, 1, 2>, scalar_prefetch = 0 : i64, scratch_operands = 1 : i64, tpu.core_type = #tpu.core_type<tc>, window_params = [{transform_indices = @transform_0, window_bounds = array<i64: 8, 512>}, {transform_indices = @transform_1, window_bounds = array<i64: 512, 384>}, {transform_indices = @transform_2, window_bounds = array<i64: 1, 384>}, {transform_indices = @transform_3, window_bounds = array<i64: 8, 384>}]} {
    %c0_i32 = arith.constant 0 : i32
    %0 = arith.cmpi eq, %arg2, %c0_i32 : i32
    %1 = arith.extui %0 : i1 to i32
    %c0_i32_0 = arith.constant 0 : i32
    %2 = arith.cmpi ne, %1, %c0_i32_0 : i32
    scf.if %2 {
      %cst_9 = arith.constant 0.000000e+00 : f32
      %12 = vector.broadcast %cst_9 : f32 to vector<8x384xf32>
      %c0_10 = arith.constant 0 : index
      %c0_11 = arith.constant 0 : index
      %13 = vector.load %arg7[%c0_10, %c0_11] : memref<8x384xf32, #tpu.memory_space<vmem>>, vector<8x384xf32>
      tpu.vector_store %arg7[%c0_10, %c0_11], %12 {strides = array<i32>} : memref<8x384xf32, #tpu.memory_space<vmem>>, vector<8x384xf32>,
    } else {
    }
    %c0 = arith.constant 0 : index
    %c0_1 = arith.constant 0 : index
    %3 = vector.load %arg7[%c0, %c0_1] : memref<8x384xf32, #tpu.memory_space<vmem>>, vector<8x384xf32>
    %c0_2 = arith.constant 0 : index
    %c0_3 = arith.constant 0 : index
    %4 = vector.load %arg3[%c0_2, %c0_3] : memref<8x512xbf16, #tpu.memory_space<vmem>>, vector<8x512xbf16>
    %c0_4 = arith.constant 0 : index
    %c0_5 = arith.constant 0 : index
    %5 = vector.load %arg4[%c0_4, %c0_5] : memref<512x384xbf16, #tpu.memory_space<vmem>>, vector<512x384xbf16>
    %cst = arith.constant dense<0.000000e+00> : vector<8x384xf32>
    %6 = tpu.matmul %4, %5, %cst {dimension_numbers = #tpu.dot_dimension_numbers<[1], [0], [0], [1], [0, 0, 1, 1], [], []>} : vector<8x512xbf16>, vector<512x384xbf16>, vector<8x384xf32> -> vector<8x384xf32>
    %7 = arith.addf %3, %6 : vector<8x384xf32>
    %c0_6 = arith.constant 0 : index
    %c0_7 = arith.constant 0 : index
    %8 = vector.load %arg7[%c0_6, %c0_7] : memref<8x384xf32, #tpu.memory_space<vmem>>, vector<8x384xf32>
    tpu.vector_store %arg7[%c0_6, %c0_7], %7 {strides = array<i32>} : memref<8x384xf32, #tpu.memory_space<vmem>>, vector<8x384xf32>,
    %c1_i32 = arith.constant 1 : i32
    %9 = arith.cmpi eq, %arg2, %c1_i32 : i32
    %10 = arith.extui %9 : i1 to i32
    %c0_i32_8 = arith.constant 0 : i32
    %11 = arith.cmpi ne, %10, %c0_i32_8 : i32
    scf.if %11 {
      %c0_9 = arith.constant 0 : index
      %c0_10 = arith.constant 0 : index
      %12 = vector.load %arg7[%c0_9, %c0_10] : memref<8x384xf32, #tpu.memory_space<vmem>>, vector<8x384xf32>
      %c0_11 = arith.constant 0 : index
      %c0_12 = arith.constant 0 : index
      %13 = vector.load %arg5[%c0_11, %c0_12] : memref<1x384xf32, #tpu.memory_space<vmem>>, vector<1x384xf32>
      %14 = vector.broadcast %13 : vector<1x384xf32> to vector<8x384xf32>
      %15 = arith.addf %12, %14 : vector<8x384xf32>
      %c0_13 = arith.constant 0 : index
      %c0_14 = arith.constant 0 : index
      %16 = vector.load %arg6[%c0_13, %c0_14] : memref<8x384xf32, #tpu.memory_space<vmem>>, vector<8x384xf32>
      tpu.vector_store %arg6[%c0_13, %c0_14], %15 {strides = array<i32>} : memref<8x384xf32, #tpu.memory_space<vmem>>, vector<8x384xf32>,
    } else {
    }
    return
  }
  func.func @transform_0(%arg0: i32, %arg1: i32, %arg2: i32) -> (i32, i32) {
    %c0_i32 = arith.constant 0 : i32
    return %arg0, %arg2 : i32, i32
  }
  func.func @transform_1(%arg0: i32, %arg1: i32, %arg2: i32) -> (i32, i32) {
    %c0_i32 = arith.constant 0 : i32
    return %arg2, %arg1 : i32, i32
  }
  func.func @transform_2(%arg0: i32, %arg1: i32, %arg2: i32) -> (i32, i32) {
    %c0_i32 = arith.constant 0 : i32
    %c0_i32_0 = arith.constant 0 : i32
    return %c0_i32, %arg1 : i32, i32
  }
  func.func @transform_3(%arg0: i32, %arg1: i32, %arg2: i32) -> (i32, i32) {
    %c0_i32 = arith.constant 0 : i32
    return %arg0, %arg1 : i32, i32
  }
}

</mosaic_0001>

<bundles_post_ra>
// kernel: tpu_custom_call.1
= control target key start
LH: loop header
LB: loop body
LE: loop exit
PB: predicated region body
PF: predicated region fallthrough
CT: control target
= control target key end

     0   :  { %8 = vsyncpa [#allocation4], 0  ;;  %s2053_s0 = inlined_call_operand.hbm [shape: bf16[8,1024], index: 0, kind: input, shape index: {}]   ;;  %s2054_s1 = inlined_call_operand.hbm [shape: bf16[1024,384], index: 1, kind: input, shape index: {}]   ;;  %s2055_s2 = inlined_call_operand.vmem [shape: f32[1,384], index: 2, kind: input, shape index: {}]   ;;  %s2056_s3 = inlined_call_operand.hbm [shape: f32[8,384], index: 3, kind: output, shape index: {}]  }
   0x1   :  { %10 = vsyncpa [#allocation4 + $0x1], 0 }
   0x2   :  { %11 = vsyncpa [#allocation7], 0 }
   0x3   :  { %13 = vsyncpa [#allocation7 + $0x1], 0 }
   0x4   :  { %14 = vsyncpa [#allocation5], 0  ;;  %s1792_s12 = smov 0   ;;  %s1794_s13 = smov 0  }
   0x5   :  { %s1796_s14 = smov 0   ;;  %s1798_s15 = smov 0  }
   0x6   :  { %s1800_s16 = smov 0   ;;  %s1802_s17 = smov 0  }
   0x7 LB: > { %s1258_s18 = sadd.s32 4294967295, %s1764_s17   ;;  %s32_s19 = sadd.s32 1, %s1760_s16  ;;  %s1764_s17 = sphi %s1802_s17, %s20_s17   ;;  %s1760_s16 = sphi %s1800_s16, %s2066_s16   ;;  %s1756_s15 = sphi %s1798_s15, %s2065_s15   ;;  %s1752_s14 = sphi %s1796_s14, %s2064_s14   ;;  %s1748_s13 = sphi %s1794_s13, %s2063_s13   ;;  %s1744_s12 = sphi %s1792_s12, %s2062_s12  }
   0x8   : > { %p33_p0 = scmp.ge.s32.totalorder %s32_s19, 2  ;;  %s48_s20 = sadd.s32 1, %s1752_s14 }
   0x9   : > { %p55_p1 = scmp.ne.s32.totalorder %s1752_s14, %s1748_s13  ;;  %p56_p2 = scmp.eq.s32.totalorder %s1764_s17, 0 }
   0xa   : > { %s2068_s19 = smov (%p33_p0, %s32_s19), 0  ;;  %p61_p4 = scmp.ne.s32.totalorder %s1748_s13, %s1744_s12 }
   0xb   : > { %p1828_p3 = por %p56_p2, %p55_p1  ;;  %s44_s22 = ssub.s32 %s1760_s16, %s2068_s19 }
   0xc   : > { %p62_p5 = scmp.eq.s32.totalorder %s1258_s18, 0  ;;  %p46_p6 = scmp.eq.s32.totalorder %s44_s22, 0 }
   0xd   : > { %p1439_p8 = scmp.lt.s32.totalorder %s1764_s17, 2  ;;  %s1846_s25 = sand.u32 1, %s1752_s14  }
   0xe   : > { %p1837_p7 = por %p62_p5, %p61_p4  ;;  %s1376_s26 = sshll.u32 %s1760_s16, 8 }
   0xf   : > { %s1843_s24 = scalar_select %p46_p6, %s1752_s14, %s48_s20  }
  0x10   : > { %s1262_s27 = sshll.u32 %s1846_s25, 4  ;;  %s187_s30 = scalar_lea.hbm %s2053_s0, %s1376_s26 }
  0x11   : > { %s179_s4 = scalar_lea.vmem [#allocation3], %s1262_s27  ;;  %p1855_p9 = pnand %p1439_p8, %p1828_p3 }
  0x12   : > { %s189_s5 = sshll.u32 %s179_s4, 4  ;;  %p1268_p10 = scmp.ge.s32.totalorder %s1764_s17, 1  ;;  %s190_s5 = int_to_ptr.vmem [resolvable:$true] %s189_s5 }
  0x13   : > { %p218_p11 = scmp.lt.s32.totalorder %s1764_s17, 3  ;;  %s176_s7 = scalar_lea.sflag [#allocation4], %s1846_s25 }
  0x14   : > { %p1628_p12 = pneg %p1855_p9  ;;  %s1639_s8 = scalar_lea.vmem %s190_s5, 256 }
  0x15   : > { %p1640_p13 = scmp.ne.s32.totalorder %s190_s5, %s1639_s8  ;;  %s1766_s9 = smov [#allocation3]  }
  0x16   : > { %s1644_s10 = sshll.u32 %s1766_s9, 4  ;;  %s1645_s10 = int_to_ptr.vmem [resolvable:$false] %s1644_s10 }
  0x17   : > { %p1642_p0 = pnand %p1640_p13, %p1628_p12  ;;  %s1646_s11 = scalar_lea.vmem %s1645_s10, 512 }
  0x18   : > { %p1647_p2 = scmp.lt.s32.totalorder %s190_s5, %s1645_s10  ;;  %p1648_p3 = scmp.lt.s32.totalorder %s1646_s11, %s1639_s8 }
  0x19   : > { %p1643_p1 = pneg %p1642_p0 }
  0x1a   : > { %p1649_p4 = por %p1648_p3, %p1647_p2 }
  0x1c   : > { %p1650_p5 = pnand %p1649_p4, %p1643_p1 }
  0x1e   : > { %1653 = shalt.err (!%p1650_p5)
}
  0x1f   : > { %1435 = dma.hbm_to_vmem [thread:$0]  (!%p1855_p9), %s187_s30, 256, %s190_s5, %s176_s7  }
  0x20   : > { %p1873_p6 = pnand %p1268_p10, %p218_p11  ;;  %s1421_s20 = smul.u32 768, %s1846_s25 }
  0x21   : > { %s1422_s21 = smul.u32 12288, %s1760_s16  ;;  %s197_s4 = scalar_lea.sflag [#allocation7], %s1846_s25 }
  0x22   : > { %s200_s28 = scalar_lea.vmem [#allocation6], %s1421_s20  ;;  %s1767_s30 = smov [#allocation6]  }
  0x23   : > { %s209_s27 = scalar_lea.hbm %s2054_s1, %s1422_s21  ;;  %s210_s29 = sshll.u32 %s200_s28, 4  ;;  %s211_s29 = int_to_ptr.vmem [resolvable:$true] %s210_s29 }
  0x24   : > { %s1667_s8 = scalar_lea.vmem %s211_s29, 12288  ;;  %s1672_s5 = sshll.u32 %s1767_s30, 4  ;;  %s1673_s5 = int_to_ptr.vmem [resolvable:$false] %s1672_s5 }
  0x25   : > { %p1668_p8 = scmp.ne.s32.totalorder %s211_s29, %s1667_s8  ;;  %s1674_s7 = scalar_lea.vmem %s1673_s5, 24576 }
  0x26   : > { %p1675_p10 = scmp.lt.s32.totalorder %s211_s29, %s1673_s5  ;;  %p1676_p11 = scmp.lt.s32.totalorder %s1674_s7, %s1667_s8 }
  0x27   : > { %p1670_p13 = pnand %p1668_p8, %p1628_p12 }
  0x28   : > { %p1677_p1 = por %p1676_p11, %p1675_p10 }
  0x29   : > { %p1671_p0 = pneg %p1670_p13 }
  0x2b   : > { %p1678_p2 = pnand %p1677_p1, %p1671_p0 }
  0x2d   : > { %1681 = shalt.err (!%p1678_p2)
}
  0x2e   : > { %s1768_s9 = smov 192   ;;  %s1769_s10 = smov 12  }
  0x2f   : > { %1438 = dma.hbm_to_vmem [thread:$0]  (!%p1855_p9), %s209_s27, 12288, %s211_s29, %s197_s4, %s1768_s9, %s1768_s9, %s1769_s10  }
  0x30   : > { %222 = sbr.rel (%p1873_p6) target bundleno = 395 (0x18b), region = 32  ;;  %s224_s25 = sand.u32 (!%p1873_p6), 1, %s1748_s13  }
  0x31   : > { %s1269_s11 = sshll.u32 (!%p1873_p6), %s224_s25, 4  ;;  %s225_s20 = scalar_lea.sflag (!%p1873_p6), [#allocation4], %s224_s25 }
  0x32   : > { %s1891_s21 = scalar_lea.vmem (!%p1873_p6), [#allocation3], %s1269_s11 }
  0x35   : > { %1731 = dma.done.wait (%p1837_p7), %s225_s20, 256  }
  0x36   : > { %1733 = vsyncadd (%p1837_p7), %s225_s20, 4294967040  ;;  %s1423_s22 = smul.u32 768, %s224_s25  ;;  %s234_s26 = scalar_lea.sflag [#allocation7], %s224_s25 }
  0x38   : > { %s1897_s6 = scalar_lea.vmem [#allocation6], %s1423_s22 }
  0x39   : > { %1735 = dma.done.wait (%p1837_p7), %s234_s26, 12288  }
  0x3a   : > { %1737 = vsyncadd (%p1837_p7), %s234_s26, 4294955008  ;;  %p1270_p9 = scmp.ne.s32.totalorder %s1756_s15, 0 }
  0x3c   : > { %277 = sbr.rel (%p1270_p9) target bundleno = 68 (0x44), region = 44 }
  0x41   : > { %v1770_v0 = vmov 0.0  }
  0x42   : > { %278 = vst [vmem:[#allocation2 + $0x10] sm:$0xff] %v1770_v0  ;;  %279 = vst [vmem:[#allocation2] sm:$0xff] %v1770_v0 }
  0x43   : > { %280 = vst [vmem:[#allocation2 + $0x8] sm:$0xff] %v1770_v0 }
  0x44 PF: > { %v1494_v1 = vld [vmem:[%s1897_s6 + $0xac] ss:$12 sps:$4 sm:$0xff]   ;;  %v1498_v3 = vld [vmem:[%s1897_s6 + $0xa8] ss:$12 sps:$4 sm:$0xff]   ;;  %v1504_v7 = vld [vmem:[%s1897_s6 + $0x90] ss:$12 sps:$4 sm:$0xff]  }
  0x45   : > { %v1496_v2 = vld [vmem:[%s1897_s6 + $0x22c] ss:$12 sps:$4 sm:$0xff]   ;;  %940 = vmatprep.subr.bf16.mxu0 %v1494_v1  ;;  %v1499_v4 = vld [vmem:[%s1897_s6 + $0x228] ss:$12 sps:$4 sm:$0xff]   ;;  %v1505_v8 = vld [vmem:[%s1897_s6 + $0x210] ss:$12 sps:$4 sm:$0xff]  }
  0x46   : > { %981 = vmatprep.subr.bf16.mxu1 %v1496_v2  ;;  %v1500_v5 = vld [vmem:[%s1897_s6 + $0x94] ss:$12 sps:$4 sm:$0xff]   ;;  %941 = vmatpush1.bf16.msra.mxu0 %v1498_v3  ;;  %v1506_v9 = vld [vmem:[%s1897_s6 + $0x7c] ss:$12 sps:$4 sm:$0xff]   ;;  %v1510_v11 = vld [vmem:[%s1897_s6 + $0x78] ss:$12 sps:$4 sm:$0xff]  }
  0x47   : > { %982 = vmatpush1.bf16.msra.mxu1 %v1499_v4  ;;  %v1502_v6 = vld [vmem:[%s1897_s6 + $0x214] ss:$12 sps:$4 sm:$0xff]   ;;  %942 = vmatprep.subr.bf16.mxu0 %v1500_v5  ;;  %v1508_v10 = vld [vmem:[%s1897_s6 + $0x1fc] ss:$12 sps:$4 sm:$0xff]   ;;  %v1511_v12 = vld [vmem:[%s1897_s6 + $0x1f8] ss:$12 sps:$4 sm:$0xff]  }
  0x48   : > { %983 = vmatprep.subr.bf16.mxu1 %v1502_v6  ;;  %v1512_v13 = vld [vmem:[%s1897_s6 + $0x64] ss:$12 sps:$4 sm:$0xff]   ;;  %v1516_v15 = vld [vmem:[%s1897_s6 + $0x60] ss:$12 sps:$4 sm:$0xff]   ;;  %v1522_v19 = vld [vmem:[%s1897_s6 + $0x48] ss:$12 sps:$4 sm:$0xff]  }
  0x49   : > { %v1514_v14 = vld [vmem:[%s1897_s6 + $0x1e4] ss:$12 sps:$4 sm:$0xff]   ;;  %v1517_v16 = vld [vmem:[%s1897_s6 + $0x1e0] ss:$12 sps:$4 sm:$0xff]   ;;  %v1523_v20 = vld [vmem:[%s1897_s6 + $0x1c8] ss:$12 sps:$4 sm:$0xff]  }
  0x4a   : > { %943 = vmatpush1.bf16.msra.mxu0 %v1504_v7  ;;  %v1518_v17 = vld [vmem:[%s1897_s6 + $0x4c] ss:$12 sps:$4 sm:$0xff]   ;;  %v1524_v21 = vld [vmem:[%s1897_s6 + $0x34] ss:$12 sps:$4 sm:$0xff]   ;;  %v1528_v23 = vld [vmem:[%s1897_s6 + $0x30] ss:$12 sps:$4 sm:$0xff]  }
  0x4b   : > { %984 = vmatpush1.bf16.msra.mxu1 %v1505_v8  ;;  %944 = vmatprep.subr.bf16.mxu0 %v1506_v9  ;;  %v1520_v18 = vld [vmem:[%s1897_s6 + $0x1cc] ss:$12 sps:$4 sm:$0xff]   ;;  %v1526_v22 = vld [vmem:[%s1897_s6 + $0x1b4] ss:$12 sps:$4 sm:$0xff]   ;;  %v1529_v24 = vld [vmem:[%s1897_s6 + $0x1b0] ss:$12 sps:$4 sm:$0xff]  }
  0x4c   : > { %985 = vmatprep.subr.bf16.mxu1 %v1508_v10  ;;  %v1530_v25 = vld [vmem:[%s1897_s6 + $0x1c] ss:$12 sps:$4 sm:$0xff]   ;;  %v1534_v27 = vld [vmem:[%s1897_s6 + $0x18] ss:$12 sps:$4 sm:$0xff]   ;;  %v1540_v31 = vld [vmem:[%s1897_s6] ss:$12 sps:$4 sm:$0xff]  }
  0x4d   : > { %v1532_v26 = vld [vmem:[%s1897_s6 + $0x19c] ss:$12 sps:$4 sm:$0xff]   ;;  %v1535_v28 = vld [vmem:[%s1897_s6 + $0x198] ss:$12 sps:$4 sm:$0xff]   ;;  %v1541_v32 = vld [vmem:[%s1897_s6 + $0x180] ss:$12 sps:$4 sm:$0xff]  }
  0x4e   : > { %945 = vmatpush1.bf16.msra.mxu0 %v1510_v11  ;;  %v1536_v29 = vld [vmem:[%s1897_s6 + $0x4] ss:$12 sps:$4 sm:$0xff]   ;;  %v1542_v33 = vld [vmem:[%s1897_s6 + $0x16c] ss:$12 sps:$4 sm:$0xff]   ;;  %v1546_v35 = vld [vmem:[%s1897_s6 + $0x168] ss:$12 sps:$4 sm:$0xff]  }
  0x4f   : > { %986 = vmatpush1.bf16.msra.mxu1 %v1511_v12  ;;  %946 = vmatprep.subr.bf16.mxu0 %v1512_v13  ;;  %v1538_v30 = vld [vmem:[%s1897_s6 + $0x184] ss:$12 sps:$4 sm:$0xff]   ;;  %v1544_v34 = vld [vmem:[%s1897_s6 + $0x2ec] ss:$12 sps:$4 sm:$0xff]   ;;  %v1547_v36 = vld [vmem:[%s1897_s6 + $0x2e8] ss:$12 sps:$4 sm:$0xff]  }
  0x50   : > { %987 = vmatprep.subr.bf16.mxu1 %v1514_v14  ;;  %v1548_v37 = vld [vmem:[%s1897_s6 + $0x154] ss:$12 sps:$4 sm:$0xff]   ;;  %v1552_v39 = vld [vmem:[%s1897_s6 + $0x150] ss:$12 sps:$4 sm:$0xff]   ;;  %v1558_v43 = vld [vmem:[%s1897_s6 + $0x138] ss:$12 sps:$4 sm:$0xff]  }
  0x51   : > { %v1550_v38 = vld [vmem:[%s1897_s6 + $0x2d4] ss:$12 sps:$4 sm:$0xff]   ;;  %v1553_v40 = vld [vmem:[%s1897_s6 + $0x2d0] ss:$12 sps:$4 sm:$0xff]   ;;  %v1559_v44 = vld [vmem:[%s1897_s6 + $0x2b8] ss:$12 sps:$4 sm:$0xff]  }
  0x52   : > { %947 = vmatpush1.bf16.msra.mxu0 %v1516_v15  ;;  %v1554_v41 = vld [vmem:[%s1897_s6 + $0x13c] ss:$12 sps:$4 sm:$0xff]   ;;  %v1560_v45 = vld [vmem:[%s1897_s6 + $0x124] ss:$12 sps:$4 sm:$0xff]   ;;  %v1564_v47 = vld [vmem:[%s1897_s6 + $0x120] ss:$12 sps:$4 sm:$0xff]  }
  0x53   : > { %988 = vmatpush1.bf16.msra.mxu1 %v1517_v16  ;;  %948 = vmatprep.subr.bf16.mxu0 %v1518_v17  ;;  %v1556_v42 = vld [vmem:[%s1897_s6 + $0x2bc] ss:$12 sps:$4 sm:$0xff]   ;;  %v1562_v46 = vld [vmem:[%s1897_s6 + $0x2a4] ss:$12 sps:$4 sm:$0xff]   ;;  %v1565_v48 = vld [vmem:[%s1897_s6 + $0x2a0] ss:$12 sps:$4 sm:$0xff]  }
  0x54   : > { %989 = vmatprep.subr.bf16.mxu1 %v1520_v18  ;;  %v284_v49 = vld [vmem:[%s1891_s21] sm:$0xff]  ;;  %v285_v51 = vld [vmem:[%s1891_s21 + $0x8] sm:$0xff]  ;;  %p1371_p7 = scmp.ne.s32.totalorder %s1756_s15, 1 }
  0x55   : > { %v1953_v50 = vcombine.high %v284_v49, %v284_v49  ;;  %v1566_v52 = vld [vmem:[%s1897_s6 + $0x10c] ss:$12 sps:$4 sm:$0xff]   ;;  %v1274_v53 = vcombine.high %v285_v51, %v285_v51  ;;  %v1570_v55 = vld [vmem:[%s1897_s6 + $0x108] ss:$12 sps:$4 sm:$0xff]   ;;  %v1576_v59 = vld [vmem:[%s1897_s6 + $0xf0] ss:$12 sps:$4 sm:$0xff]   ;;  %v1976_v8 = vcombine.low %v284_v49, %v284_v49  ;;  %v1978_v9 = vcombine.low %v285_v51, %v285_v51 }
  0x56   : > { %949 = vmatpush1.bf16.msra.mxu0 %v1522_v19  ;;  %v1568_v54 = vld [vmem:[%s1897_s6 + $0x28c] ss:$12 sps:$4 sm:$0xff]   ;;  %v1571_v56 = vld [vmem:[%s1897_s6 + $0x288] ss:$12 sps:$4 sm:$0xff]   ;;  %v1577_v60 = vld [vmem:[%s1897_s6 + $0x270] ss:$12 sps:$4 sm:$0xff]  }
  0x57   : > { %990 = vmatpush1.bf16.msra.mxu1 %v1523_v20  ;;  %950 = vmatprep.subr.bf16.mxu0 %v1524_v21  ;;  %v1572_v57 = vld [vmem:[%s1897_s6 + $0xf4] ss:$12 sps:$4 sm:$0xff]   ;;  %v1578_v61 = vld [vmem:[%s1897_s6 + $0xdc] ss:$12 sps:$4 sm:$0xff]   ;;  %v1582_v63 = vld [vmem:[%s1897_s6 + $0xd8] ss:$12 sps:$4 sm:$0xff]  }
  0x58   : > { %991 = vmatprep.subr.bf16.mxu1 %v1526_v22  ;;  %972 = vmatprep.mubr.bf16.mxu0 %v1953_v50  ;;  %v1574_v58 = vld [vmem:[%s1897_s6 + $0x274] ss:$12 sps:$4 sm:$0xff]   ;;  %v1580_v62 = vld [vmem:[%s1897_s6 + $0x25c] ss:$12 sps:$4 sm:$0xff]   ;;  %v1583_v0 = vld [vmem:[%s1897_s6 + $0x258] ss:$12 sps:$4 sm:$0xff]  }
  0x59   : > { %1013 = vmatprep.mubr.bf16.mxu1 %v1274_v53  ;;  %v1584_v1 = vld [vmem:[%s1897_s6 + $0xc4] ss:$12 sps:$4 sm:$0xff]   ;;  %v1588_v3 = vld [vmem:[%s1897_s6 + $0xc0] ss:$12 sps:$4 sm:$0xff]   ;;  %v1606_v19 = vld [vmem:[%s1897_s6 + $0x128] ss:$12 sps:$4 sm:$0xff]  }
  0x5a   : > { %951 = vmatpush1.bf16.msra.mxu0 %v1528_v23  ;;  %v1586_v2 = vld [vmem:[%s1897_s6 + $0x244] ss:$12 sps:$4 sm:$0xff]   ;;  %v1589_v4 = vld [vmem:[%s1897_s6 + $0x240] ss:$12 sps:$4 sm:$0xff]   ;;  %v1607_v20 = vld [vmem:[%s1897_s6 + $0x2a8] ss:$12 sps:$4 sm:$0xff]  }
  0x5b   : > { %992 = vmatpush1.bf16.msra.mxu1 %v1529_v24  ;;  %952 = vmatprep.subr.bf16.mxu0 %v1530_v25  ;;  %v1594_v5 = vld [vmem:[%s1897_s6 + $0x170] ss:$12 sps:$4 sm:$0xff]   ;;  %v1598_v11 = vld [vmem:[%s1897_s6 + $0x158] ss:$12 sps:$4 sm:$0xff]   ;;  %v1602_v15 = vld [vmem:[%s1897_s6 + $0x140] ss:$12 sps:$4 sm:$0xff]  }
  0x5c   : > { %993 = vmatprep.subr.bf16.mxu1 %v1532_v26  ;;  %v1595_v6 = vld [vmem:[%s1897_s6 + $0x2f0] ss:$12 sps:$4 sm:$0xff]   ;;  %v1599_v12 = vld [vmem:[%s1897_s6 + $0x2d8] ss:$12 sps:$4 sm:$0xff]   ;;  %v1603_v16 = vld [vmem:[%s1897_s6 + $0x2c0] ss:$12 sps:$4 sm:$0xff]  }
  0x5d   : > { %v1596_v7 = vld [vmem:[%s1897_s6 + $0xb0] ss:$12 sps:$4 sm:$0xff]   ;;  %v1600_v13 = vld [vmem:[%s1897_s6 + $0x98] ss:$12 sps:$4 sm:$0xff]   ;;  %v1604_v17 = vld [vmem:[%s1897_s6 + $0x80] ss:$12 sps:$4 sm:$0xff]  }
  0x5e   : > { %953 = vmatpush1.bf16.msra.mxu0 %v1534_v27  ;;  %v1597_v10 = vld [vmem:[%s1897_s6 + $0x230] ss:$12 sps:$4 sm:$0xff]   ;;  %v1601_v14 = vld [vmem:[%s1897_s6 + $0x218] ss:$12 sps:$4 sm:$0xff]   ;;  %v1605_v18 = vld [vmem:[%s1897_s6 + $0x200] ss:$12 sps:$4 sm:$0xff]  }
  0x5f   : > { %994 = vmatpush1.bf16.msra.mxu1 %v1535_v28  ;;  %954 = vmatprep.subr.bf16.mxu0 %v1536_v29  ;;  %v1608_v21 = vld [vmem:[%s1897_s6 + $0x68] ss:$12 sps:$4 sm:$0xff]   ;;  %v1610_v23 = vld [vmem:[%s1897_s6 + $0x110] ss:$12 sps:$4 sm:$0xff]   ;;  %v1614_v27 = vld [vmem:[%s1897_s6 + $0xf8] ss:$12 sps:$4 sm:$0xff]  }
  0x60   : > { %995 = vmatprep.subr.bf16.mxu1 %v1538_v30  ;;  %v1609_v22 = vld [vmem:[%s1897_s6 + $0x1e8] ss:$12 sps:$4 sm:$0xff]   ;;  %v1611_v24 = vld [vmem:[%s1897_s6 + $0x290] ss:$12 sps:$4 sm:$0xff]   ;;  %v1615_v28 = vld [vmem:[%s1897_s6 + $0x278] ss:$12 sps:$4 sm:$0xff]  }
  0x61   : > { %v1612_v25 = vld [vmem:[%s1897_s6 + $0x50] ss:$12 sps:$4 sm:$0xff]   ;;  %v1616_v29 = vld [vmem:[%s1897_s6 + $0x38] ss:$12 sps:$4 sm:$0xff]  }
  0x62   : > { %955 = vmatpush1.bf16.msra.mxu0 %v1540_v31  ;;  %v1613_v26 = vld [vmem:[%s1897_s6 + $0x1d0] ss:$12 sps:$4 sm:$0xff]   ;;  %v1617_v30 = vld [vmem:[%s1897_s6 + $0x1b8] ss:$12 sps:$4 sm:$0xff]   ;;  %v1618_v31 = vld [vmem:[%s1897_s6 + $0xe0] ss:$12 sps:$4 sm:$0xff]  }
  0x63   : > { %996 = vmatpush1.bf16.msra.mxu1 %v1541_v32  ;;  %956 = vmatprep.subr.bf16.mxu0 %v1542_v33  ;;  %v1619_v32 = vld [vmem:[%s1897_s6 + $0x260] ss:$12 sps:$4 sm:$0xff]  }
  0x64   : > { %997 = vmatprep.subr.bf16.mxu1 %v1544_v34  ;;  %v1620_v33 = vld [vmem:[%s1897_s6 + $0x20] ss:$12 sps:$4 sm:$0xff]  }
  0x65   : > { %v1621_v34 = vld [vmem:[%s1897_s6 + $0x1a0] ss:$12 sps:$4 sm:$0xff]  }
  0x66   : > { %957 = vmatpush2.bf16.msra.mxu0 %v1546_v35  ;;  %v1622_v35 = vld [vmem:[%s1897_s6 + $0xc8] ss:$12 sps:$4 sm:$0xff]  }
  0x67   : > { %998 = vmatpush2.bf16.msra.mxu1 %v1547_v36  ;;  %958 = vmatprep.subr.bf16.mxu0 %v1548_v37  ;;  %v1623_v36 = vld [vmem:[%s1897_s6 + $0x248] ss:$12 sps:$4 sm:$0xff]  }
  0x68   : > { %999 = vmatprep.subr.bf16.mxu1 %v1550_v38  ;;  %v1624_v37 = vld [vmem:[%s1897_s6 + $0x8] ss:$12 sps:$4 sm:$0xff]  }
  0x69   : > { %v1625_v38 = vld [vmem:[%s1897_s6 + $0x188] ss:$12 sps:$4 sm:$0xff]  }
  0x6a   : > { %959 = vmatpush2.bf16.msra.mxu0 %v1552_v39 }
  0x6b   : > { %1000 = vmatpush2.bf16.msra.mxu1 %v1553_v40  ;;  %960 = vmatprep.subr.bf16.mxu0 %v1554_v41  ;;  %v281_v40 = vld [vmem:[#allocation2 + $0x10] sm:$0xff] }
  0x6c   : > { %1001 = vmatprep.subr.bf16.mxu1 %v1556_v42 }
  0x6e   : > { %961 = vmatpush2.bf16.msra.mxu0 %v1558_v43 }
  0x6f   : > { %1002 = vmatpush2.bf16.msra.mxu1 %v1559_v44  ;;  %962 = vmatprep.subr.bf16.mxu0 %v1560_v45  ;;  %v282_v44 = vld [vmem:[#allocation2] sm:$0xff] }
  0x70   : > { %1003 = vmatprep.subr.bf16.mxu1 %v1562_v46 }
  0x72   : > { %963 = vmatpush2.bf16.msra.mxu0 %v1564_v47 }
  0x73   : > { %1004 = vmatpush2.bf16.msra.mxu1 %v1565_v48  ;;  %964 = vmatprep.subr.bf16.mxu0 %v1566_v52 }
  0x74   : > { %1005 = vmatprep.subr.bf16.mxu1 %v1568_v54 }
  0x76   : > { %965 = vmatpush2.bf16.msra.mxu0 %v1570_v55 }
  0x77   : > { %1006 = vmatpush2.bf16.msra.mxu1 %v1571_v56  ;;  %966 = vmatprep.subr.bf16.mxu0 %v1572_v57 }
  0x78   : > { %1007 = vmatprep.subr.bf16.mxu1 %v1574_v58 }
  0x7a   : > { %967 = vmatpush2.bf16.msra.mxu0 %v1576_v59  ;;  %v283_v59 = vld [vmem:[#allocation2 + $0x8] sm:$0xff] }
  0x7b   : > { %1008 = vmatpush2.bf16.msra.mxu1 %v1577_v60  ;;  %968 = vmatprep.subr.bf16.mxu0 %v1578_v61 }
  0x7c   : > { %1009 = vmatprep.subr.bf16.mxu1 %v1580_v62 }
  0x7e   : > { %969 = vmatpush2.bf16.msra.mxu0 %v1582_v63 }
  0x7f   : > { %1010 = vmatpush2.bf16.msra.mxu1 %v1583_v0  ;;  %970 = vmatprep.subr.bf16.mxu0 %v1584_v1 }
  0x80   : > { %1011 = vmatprep.subr.bf16.mxu1 %v1586_v2 }
  0x82   : > { %971 = vmatpush2.bf16.msra.mxu0 %v1588_v3 }
  0x83   : > { %1012 = vmatpush2.bf16.msra.mxu1 %v1589_v4  ;;  %1377 = vmatprep.subr.bf16.mxu0 %v1594_v5 }
  0x84   : > { %1399 = vmatprep.subr.bf16.mxu1 %v1595_v6 }
  0x85   : > { %973 = vmatmul.mubr.bf16.vlgmr.msra.gmra.mxu0 %v1976_v8 }
  0x86   : > { %1014 = vmatmul.mubr.bf16.vlgmr.msra.gmra.mxu1 %v1978_v9  ;;  %1378 = vmatpush3.bf16.msra.mxu0 %v1596_v7 }
  0x87   : > { %1400 = vmatpush3.bf16.msra.mxu1 %v1597_v10  ;;  %1379 = vmatprep.subr.bf16.mxu0 %v1598_v11 }
  0x88   : > { %1401 = vmatprep.subr.bf16.mxu1 %v1599_v12  ;;  %1054 = vmatprep.mubr.bf16.mxu0 %v1953_v50 }
  0x89   : > { %1094 = vmatprep.mubr.bf16.mxu1 %v1274_v53 }
  0x8a   : > { %1380 = vmatpush3.bf16.msra.mxu0 %v1600_v13 }
  0x8b   : > { %1402 = vmatpush3.bf16.msra.mxu1 %v1601_v14  ;;  %1381 = vmatprep.subr.bf16.mxu0 %v1602_v15 }
  0x8c   : > { %1403 = vmatprep.subr.bf16.mxu1 %v1603_v16 }
  0x8e   : > { %1382 = vmatpush3.bf16.msra.mxu0 %v1604_v17 }
  0x8f   : > { %1404 = vmatpush3.bf16.msra.mxu1 %v1605_v18  ;;  %1383 = vmatprep.subr.bf16.mxu0 %v1606_v19 }
  0x90   : > { %1405 = vmatprep.subr.bf16.mxu1 %v1607_v20 }
  0x92   : > { %1384 = vmatpush3.bf16.msra.mxu0 %v1608_v21 }
  0x93   : > { %1406 = vmatpush3.bf16.msra.mxu1 %v1609_v22  ;;  %1385 = vmatprep.subr.bf16.mxu0 %v1610_v23 }
  0x94   : > { %1407 = vmatprep.subr.bf16.mxu1 %v1611_v24 }
  0x96   : > { %1386 = vmatpush3.bf16.msra.mxu0 %v1612_v25 }
  0x97   : > { %1408 = vmatpush3.bf16.msra.mxu1 %v1613_v26  ;;  %1387 = vmatprep.subr.bf16.mxu0 %v1614_v27 }
  0x98   : > { %1409 = vmatprep.subr.bf16.mxu1 %v1615_v28 }
  0x9a   : > { %1388 = vmatpush3.bf16.msra.mxu0 %v1616_v29 }
  0x9b   : > { %1410 = vmatpush3.bf16.msra.mxu1 %v1617_v30  ;;  %1389 = vmatprep.subr.bf16.mxu0 %v1618_v31 }
  0x9c   : > { %1411 = vmatprep.subr.bf16.mxu1 %v1619_v32 }
  0x9e   : > { %1390 = vmatpush3.bf16.msra.mxu0 %v1620_v33 }
  0x9f   : > { %1412 = vmatpush3.bf16.msra.mxu1 %v1621_v34  ;;  %1391 = vmatprep.subr.bf16.mxu0 %v1622_v35 }
  0xa0   : > { %1413 = vmatprep.subr.bf16.mxu1 %v1623_v36 }
  0xa2   : > { %1392 = vmatpush3.bf16.msra.mxu0 %v1624_v37 }
  0xa3   : > { %1414 = vmatpush3.bf16.msra.mxu1 %v1625_v38 }
  0xa5   : > { %1055 = vmatmul.mubr.bf16.vlgmr.msra.gmra.mxu0 %v1976_v8 }
  0xa6   : > { %1095 = vmatmul.mubr.bf16.vlgmr.msra.gmra.mxu1 %v1978_v9 }
 0x145   : > { %v974_v39 = vpop.f32.mrf.mxu0 }
 0x146   : > { %v1015_v41 = vpop.f32.mrf.mxu1 }
 0x147   : > { %v1016_v42 = vadd.f32 %v1015_v41, %v974_v39  ;;  %v976_v43 = vpop.f32.mrf.mxu0 }
 0x148   : > { %v1017_v45 = vpop.f32.mrf.mxu1 }
 0x149   : > { %v1102_v46 = vadd.f32 %v1016_v42, %v281_v40  ;;  %v1018_v47 = vadd.f32 %v1017_v45, %v976_v43  ;;  %v978_v48 = vpop.f32.mrf.mxu0 }
 0x14a   : > { %v1019_v49 = vpop.f32.mrf.mxu1 }
 0x14b   : > { %1105 = vst [vmem:[#allocation2 + $0x10] sm:$0xff] %v1102_v46  ;;  %v1103_v50 = vadd.f32 %v1018_v47, %v282_v44  ;;  %v979_v51 = vpop.f32.mrf.mxu0 }
 0x14c   : > { %v1020_v52 = vpop.f32.mrf.mxu1 }
 0x14d   : > { %1106 = vst [vmem:[#allocation2] sm:$0xff] %v1103_v50 }
 0x165   : > { %v1393_v53 = vpop.f32.mrf.mxu0 }
 0x166   : > { %v1415_v54 = vpop.f32.mrf.mxu1 }
 0x167   : > { %v1394_v55 = vpop.f32.mrf.mxu0 }
 0x168   : > { %v1416_v56 = vpop.f32.mrf.mxu1  ;;  %v1395_v57 = vadd.f32 %v1394_v55, %v1393_v53 }
 0x169   : > { %v1417_v58 = vadd.f32 %v1416_v56, %v1415_v54  ;;  %v1396_v60 = vpop.f32.mrf.mxu0 }
 0x16a   : > { %v1418_v61 = vpop.f32.mrf.mxu1 }
 0x16b   : > { %v1097_v62 = vadd.f32 %v1417_v58, %v1395_v57  ;;  %v1397_v63 = vpop.f32.mrf.mxu0  ;;  %1111 = sbr.rel (%p1371_p7) target bundleno = 380 (0x17c), region = 48 }
 0x16c   : > { %v1419_v0 = vpop.f32.mrf.mxu1 }
 0x16d   : > { %v1104_v1 = vadd.f32 %v1097_v62, %v283_v59 }
 0x16f   : > { %1107 = vst [vmem:[#allocation2 + $0x8] sm:$0xff] %v1104_v1 }
 0x170   : > { %v1117_v2 = vlaneseq  ;;  %v1115_v4 = vld [vmem:[%s2055_s2] sm:$0x7]  ;;  %v1112_v8 = vld [vmem:[#allocation2 + $0x10] sm:$0xff] }
 0x171   : > { %v1113_v9 = vld [vmem:[#allocation2] sm:$0xff] }
 0x172   : > { %v1118_v3 = vshrl.u32 %v1117_v2, 7 }
 0x174   : > { %v1119_v5 = vsub.s32 0, %v1118_v3  ;;  %v1123_v6 = vsub.s32 1, %v1118_v3  ;;  %v1127_v7 = vsub.s32 2, %v1118_v3 }
 0x176   : > { %v1114_v10 = vld [vmem:[#allocation2 + $0x8] sm:$0xff]  ;;  %v1120_v11 = vrot.slane %v1115_v4, %v1119_v5  ;;  %v1124_v12 = vrot.slane %v1115_v4, %v1123_v6  ;;  %v1128_v13 = vrot.slane %v1115_v4, %v1127_v7 }
 0x178   : > { %v1132_v14 = vadd.f32 %v1120_v11, %v1112_v8  ;;  %v1133_v15 = vadd.f32 %v1124_v12, %v1113_v9  ;;  %v1134_v16 = vadd.f32 %v1128_v13, %v1114_v10 }
 0x17a   : > { %1135 = vst [vmem:[#allocation8] sm:$0xff] %v1132_v14  ;;  %1136 = vst [vmem:[#allocation8 + $0x8] sm:$0xff] %v1133_v15 }
 0x17b   : > { %1137 = vst [vmem:[#allocation8 + $0x10] sm:$0xff] %v1134_v16 }
 0x17c PF: > { %p2020_p12 = scmp.eq.s32.totalorder %s1258_s18, 1  ;;  %s1771_s27 = smov [#allocation8]  }
 0x17d   : > { %s1150_s28 = sshll.u32 %s1771_s27, 4  ;;  %s1151_s28 = int_to_ptr.vmem [resolvable:$true] %s1150_s28 }
 0x17e   : > { %s1682_s29 = scalar_lea.vmem %s1151_s28, 384  ;;  %p1689_p6 = scmp.lt.s32.totalorder %s1151_s28, %s1151_s28 }
 0x17f   : > { %p1683_p3 = scmp.ne.s32.totalorder %s1151_s28, %s1682_s29  ;;  %p1690_p8 = scmp.lt.s32.totalorder %s1682_s29, %s1682_s29 }
 0x181   : > { %p1684_p4 = pnand %p1683_p3, %p2020_p12  ;;  %p1691_p13 = por %p1690_p8, %p1689_p6 }
 0x183   : > { %p1685_p5 = pneg %p1684_p4 }
 0x185   : > { %p1692_p0 = pnand %p1691_p13, %p1685_p5 }
 0x187   : > { %1695 = shalt.err (!%p1692_p0)
}
 0x188   : > { %1429 = dma.vmem_to_hbm [thread:$0]  (%p2020_p12), %s1151_s28, 384, %s2056_s3, [#allocation5]  }
 0x189   : > { %1739 = dma.done.wait (%p2020_p12), [#allocation5], 384  }
 0x18a   : > { %1741 = vsyncadd (%p2020_p12), [#allocation5], 4294966912 }
 0x18b PF: > { %s20_s17 = sadd.s32 1, %s1764_s17   ;;  %s2062_s12 = smov %s1748_s13 }
 0x18c   : > { %p17_p10 = scmp.ge.s32.totalorder %s20_s17, 4   ;;  %s2063_s13 = smov %s1752_s14 }
 0x18d   : > { %s2064_s14 = smov %s1843_s24  ;;  %s2065_s15 = smov %s1760_s16 }
 0x18e   : > { %s2066_s16 = smov %s2068_s19  ;;  %19 = sbr.rel (!%p17_p10) target bundleno = 7 (0x7), region = 94 }
 0x193   :  { %1163 = vsyncpa [#allocation4], 1 }
 0x194   :  { %1165 = vsyncpa [#allocation4 + $0x1], 1 }
 0x195   :  { %1166 = vsyncpa [#allocation7], 1 }
 0x196   :  { %1168 = vsyncpa [#allocation7 + $0x1], 1 }
 0x197   :  { %1169 = vsyncpa [#allocation5], 1 }
 0x198   :  { %1171 = vsyncpa [#allocation5 + $0x1], 1 }

</bundles_post_ra>
